<compile_context>
chip_gen: v6e
topology: v6e:2x2x1
jax: 0.10.0
libtpu: 0.0.40
codegen_flags: <defaults>
</compile_context>

<pallas_src>
import jax
import jax.numpy as jnp
from jax.experimental import pallas as pl
from jax.experimental.pallas import tpu as pltpu


def value_kernel(xT_ref, w1_ref, b1_ref, w2_ref, b2_ref, oT_ref):
    # xT_ref: (state_dim, TB)   w1_ref: (H, state_dim)   b1_ref: (H, 1)
    # w2_ref: (1, H)            b2_ref: (1, 1) in SMEM   oT_ref: (1, TB)
    # hidden^T = relu(W1 @ x^T + b1): (H, TB), batch on lanes.
    h = jnp.dot(w1_ref[...], xT_ref[...], preferred_element_type=jnp.float32)
    h = jnp.maximum(h + b1_ref[...], 0.0)
    # value^T = W2 @ hidden^T + b2: (1, TB) — N = batch tile, lane-dense output.
    v = jnp.dot(w2_ref[...], h, preferred_element_type=jnp.float32)
    oT_ref[...] = v + b2_ref[0, 0]


def _round_up(n, m):
    return ((n + m - 1) // m) * m


def value_forward(x, w1, b1, w2, b2, *, batch_tile=512):
    """x: (B, state_dim) f32.
    w1: (H, state_dim), b1: (H, 1), w2: (1, H), b2: (1, 1) — torch Linear layout.
    Returns (B, 1) f32."""
    B, state_dim = x.shape
    H = w1.shape[0]

    # Lane (batch) tile: multiple of 256 (v6e/v7x MXU width; also /128 for v5e).
    lane_tile = min(_round_up(batch_tile, 256), _round_up(B, 256))
    Bp = _round_up(B, lane_tile)

    # Layout plumbing in the wrapper: batch onto lanes, pad to the tile grid.
    xT = jnp.pad(x.T, ((0, 0), (0, Bp - B)))          # (state_dim, Bp)

    outT = pl.pallas_call(
        value_kernel,
        out_shape=jax.ShapeDtypeStruct((1, Bp), jnp.float32),
        grid=(Bp // lane_tile,),
        in_specs=[
            # x^T tiled along batch (lane) axis.
            pl.BlockSpec((state_dim, lane_tile), lambda i: (0, i)),
            # Weights / bias: constant index_map -> stay VMEM-resident.
            pl.BlockSpec((H, state_dim), lambda i: (0, 0)),
            pl.BlockSpec((H, 1), lambda i: (0, 0)),
            pl.BlockSpec((1, H), lambda i: (0, 0)),
            # b2 is a single scalar: keep it in SMEM, no padded VMEM tile.
            pl.BlockSpec(memory_space=pltpu.MemorySpace.SMEM),
        ],
        out_specs=pl.BlockSpec((1, lane_tile), lambda i: (0, i)),
        compiler_params=pltpu.CompilerParams(
            dimension_semantics=("parallel",),  # megacore / v7x 2-TC sharding
        ),
    )(xT, w1, b1, w2, b2)

    return outT[:, :B].T                               # back to (B, 1)


def init_params(key, state_dim, hidden_dim):
    """Deterministic init mimicking torch.nn.Linear (uniform ±1/sqrt(fan_in)),
    stored in torch layout: weight = (out_features, in_features)."""
    k1, k2, k3, k4 = jax.random.split(key, 4)
    bound1 = 1.0 / jnp.sqrt(state_dim)
    bound2 = 1.0 / jnp.sqrt(hidden_dim)
    w1 = jax.random.uniform(k1, (hidden_dim, state_dim), jnp.float32, -bound1, bound1)
    b1 = jax.random.uniform(k2, (hidden_dim, 1), jnp.float32, -bound1, bound1)
    w2 = jax.random.uniform(k3, (1, hidden_dim), jnp.float32, -bound2, bound2)
    b2 = jax.random.uniform(k4, (1, 1), jnp.float32, -bound2, bound2)
    return w1, b1, w2, b2


def _reference(x, w1, b1, w2, b2):
    return jnp.maximum(x @ w1.T + b1.T, 0.0) @ w2.T + b2


if __name__ == "__main__":
    # Small shapes consistent with a gym control task (e.g. CartPole: state_dim=4).
    state_dim = 4
    hidden_dim = 16
    batch = 8

    key = jax.random.PRNGKey(0)
    k_params, k_x, k_big = jax.random.split(key, 3)
    w1, b1, w2, b2 = init_params(k_params, state_dim, hidden_dim)

    # Small batch (single grid step, padded to one 256-lane tile).
    x = jax.random.normal(k_x, (batch, state_dim), jnp.float32)
    out = value_forward(x, w1, b1, w2, b2)
    out = jax.block_until_ready(out)
    ref = _reference(x, w1, b1, w2, b2)
    assert out.shape == (batch, 1)
    assert jnp.allclose(out, ref, atol=1e-5, rtol=1e-5)

    # Larger, non-aligned batch to exercise the gridded / padded path.
    big_batch = 1037
    xb = jax.random.normal(k_big, (big_batch, state_dim), jnp.float32)
    outb = jax.block_until_ready(value_forward(xb, w1, b1, w2, b2))
    refb = _reference(xb, w1, b1, w2, b2)
    assert outb.shape == (big_batch, 1)
    assert jnp.allclose(outb, refb, atol=1e-5, rtol=1e-5)

    print("KERNEL_OK")
</pallas_src>

<mosaic_0001>
module attributes {stable_mosaic.version = 11 : i64} {
  func.func @value_kernel(%arg0: i32, %arg1: memref<4x256xf32, #tpu.memory_space<vmem>>, %arg2: memref<16x4xf32, #tpu.memory_space<vmem>>, %arg3: memref<16x1xf32, #tpu.memory_space<vmem>>, %arg4: memref<1x16xf32, #tpu.memory_space<vmem>>, %arg5: memref<1x1xf32, #tpu.memory_space<smem>>, %arg6: memref<1x256xf32, #tpu.memory_space<vmem>>) attributes {dimension_semantics = [#tpu.dimension_semantics<parallel>], iteration_bounds = array<i64: 1>, scalar_prefetch = 0 : i64, scratch_operands = 0 : i64, tpu.core_type = #tpu.core_type<tc>, window_params = [{transform_indices = @transform_0, window_bounds = array<i64: 4, 256>}, {pipeline_mode = #tpu.pipeline_mode<synchronous>, transform_indices = @transform_1, window_bounds = array<i64: 16, 4>}, {pipeline_mode = #tpu.pipeline_mode<synchronous>, transform_indices = @transform_2, window_bounds = array<i64: 16, 1>}, {pipeline_mode = #tpu.pipeline_mode<synchronous>, transform_indices = @transform_3, window_bounds = array<i64: 1, 16>}, {transform_indices = @transform_4, window_bounds = array<i64: 1, 1>}, {transform_indices = @transform_5, window_bounds = array<i64: 1, 256>}]} {
    %c0 = arith.constant 0 : index
    %c0_0 = arith.constant 0 : index
    %0 = vector.load %arg2[%c0, %c0_0] : memref<16x4xf32, #tpu.memory_space<vmem>>, vector<16x4xf32>
    %c0_1 = arith.constant 0 : index
    %c0_2 = arith.constant 0 : index
    %1 = vector.load %arg1[%c0_1, %c0_2] : memref<4x256xf32, #tpu.memory_space<vmem>>, vector<4x256xf32>
    %cst = arith.constant dense<0.000000e+00> : vector<16x256xf32>
    %2 = tpu.matmul %0, %1, %cst {dimension_numbers = #tpu.dot_dimension_numbers<[1], [0], [0], [1], [0, 0, 1, 1], [], []>} : vector<16x4xf32>, vector<4x256xf32>, vector<16x256xf32> -> vector<16x256xf32>
    %c0_3 = arith.constant 0 : index
    %c0_4 = arith.constant 0 : index
    %3 = vector.load %arg3[%c0_3, %c0_4] : memref<16x1xf32, #tpu.memory_space<vmem>>, vector<16x1xf32>
    %4 = vector.broadcast %3 : vector<16x1xf32> to vector<16x256xf32>
    %5 = arith.addf %2, %4 : vector<16x256xf32>
    %cst_5 = arith.constant 0.000000e+00 : f32
    %6 = vector.broadcast %cst_5 : f32 to vector<16x256xf32>
    %7 = arith.maximumf %5, %6 : vector<16x256xf32>
    %c0_6 = arith.constant 0 : index
    %c0_7 = arith.constant 0 : index
    %8 = vector.load %arg4[%c0_6, %c0_7] : memref<1x16xf32, #tpu.memory_space<vmem>>, vector<1x16xf32>
    %cst_8 = arith.constant dense<0.000000e+00> : vector<1x256xf32>
    %9 = tpu.matmul %8, %7, %cst_8 {dimension_numbers = #tpu.dot_dimension_numbers<[1], [0], [0], [1], [0, 0, 1, 1], [], []>} : vector<1x16xf32>, vector<16x256xf32>, vector<1x256xf32> -> vector<1x256xf32>
    %c0_9 = arith.constant 0 : index
    %c0_10 = arith.constant 0 : index
    %10 = memref.load %arg5[%c0_9, %c0_10] : memref<1x1xf32, #tpu.memory_space<smem>>
    %11 = vector.broadcast %10 : f32 to vector<1x256xf32>
    %12 = arith.addf %9, %11 : vector<1x256xf32>
    %c0_11 = arith.constant 0 : index
    %c0_12 = arith.constant 0 : index
    %13 = vector.load %arg6[%c0_11, %c0_12] : memref<1x256xf32, #tpu.memory_space<vmem>>, vector<1x256xf32>
    tpu.vector_store %arg6[%c0_11, %c0_12], %12 {strides = array<i32>} : memref<1x256xf32, #tpu.memory_space<vmem>>, vector<1x256xf32>,
    return
  }
  func.func @transform_0(%arg0: i32) -> (i32, i32) {
    %c0_i32 = arith.constant 0 : i32
    %c0_i32_0 = arith.constant 0 : i32
    return %c0_i32, %arg0 : i32, i32
  }
  func.func @transform_1(%arg0: i32) -> (i32, i32) {
    %c0_i32 = arith.constant 0 : i32
    %c0_i32_0 = arith.constant 0 : i32
    %c0_i32_1 = arith.constant 0 : i32
    return %c0_i32, %c0_i32_0 : i32, i32
  }
  func.func @transform_2(%arg0: i32) -> (i32, i32) {
    %c0_i32 = arith.constant 0 : i32
    %c0_i32_0 = arith.constant 0 : i32
    %c0_i32_1 = arith.constant 0 : i32
    return %c0_i32, %c0_i32_0 : i32, i32
  }
  func.func @transform_3(%arg0: i32) -> (i32, i32) {
    %c0_i32 = arith.constant 0 : i32
    %c0_i32_0 = arith.constant 0 : i32
    %c0_i32_1 = arith.constant 0 : i32
    return %c0_i32, %c0_i32_0 : i32, i32
  }
  func.func @transform_4(%arg0: i32) -> (i32, i32) {
    %c0_i32 = arith.constant 0 : i32
    %c0_i32_0 = arith.constant 0 : i32
    %c0_i32_1 = arith.constant 0 : i32
    return %c0_i32, %c0_i32_0 : i32, i32
  }
  func.func @transform_5(%arg0: i32) -> (i32, i32) {
    %c0_i32 = arith.constant 0 : i32
    %c0_i32_0 = arith.constant 0 : i32
    return %c0_i32, %arg0 : i32, i32
  }
}

</mosaic_0001>

<bundles_post_ra>
// kernel: tpu_custom_call.1
= control target key start
LH: loop header
LB: loop body
LE: loop exit
PB: predicated region body
PF: predicated region fallthrough
CT: control target
= control target key end

     0   :  { %vm46_vm0 = vcmask 1043456   ;;  %v280_v2 = vmov 0.0   ;;  %s338_s0 = inlined_call_operand.vmem [shape: f32[4,256], index: 0, kind: input, shape index: {}]   ;;  %s339_s1 = inlined_call_operand.vmem [shape: f32[16,4], index: 1, kind: input, shape index: {}]   ;;  %s340_s2 = inlined_call_operand.vmem [shape: f32[16,1], index: 2, kind: input, shape index: {}]   ;;  %s341_s3 = inlined_call_operand.vmem [shape: f32[1,16], index: 3, kind: input, shape index: {}]   ;;  %s342_s4 = inlined_call_operand.<no memory space> [shape: f32[1,1], index: 4, kind: input, shape index: {}]   ;;  %s343_s5 = inlined_call_operand.hbm [shape: f32[1,256], index: 5, kind: output, shape index: {}]  }
   0x1   :  { %v24_v0 = vld [vmem:[%s338_s0] sm:$0xff]  ;;  %115 = vmatprep.mubr.f32.mxu0 %v280_v2  ;;  %v26_v3 = vld [vmem:[%s340_s2 + $0x8] sm:$0xff]  ;;  %203 = vmatprep.mubr.f32.mxu1 %v280_v2 }
   0x2   :  { %v38_v1 = vcombine.high %v24_v0, %v24_v0 }
   0x3   :  { %11 = vsyncpa [#allocation4], 0  ;;  %v22_v4 = vld [vmem:[%s339_s1] sm:$0xff]  ;;  %vm39_vm1 = vcmask 31744   ;;  %v281_v5 = vmov 0   ;;  %v23_v7 = vld [vmem:[%s339_s1 + $0x8] sm:$0xff]  ;;  %v216_v25 = vlaneseq  ;;  %v134_v28 = vstv %s342_s4 }
   0x4   :  { %256 = vset.pattern.permute.xlu0 %v281_v5  ;;  %247 = vmatprep.subr.msk.mxu0 %vm46_vm0, %v38_v1  ;;  %v25_v6 = vld [vmem:[%s340_s2] sm:$0xff]  ;;  %vm135_vm2 = vcmask 130048   ;;  %v282_v23 = vmov 1966171168  }
   0x5   :  { %34 = vperm.xlu0 %256, %v26_v3   ;;  %248 = vmatpush1.msk.msra.mxu0 %vm46_vm0, %v24_v0  ;;  %v132_v22 = vld [vmem:[%s341_s3] sm:$0x1]  ;;  %v214_v24 = vunpack.c.l.s4 %v282_v23  ;;  %v217_v27 = vshrl.u32 %v216_v25, 7  ;;  %s283_s3 = smov [#allocation3]   ;;  %vm230_vm3 = vcmp.lt.s32.totalorder %v216_v25, 256 }
   0x6   :  { %249 = vmatmul.mubr.msk.f32.vlgmr.msra.gmra.mxu0 %vm39_vm1, %v22_v4  ;;  %s239_s29 = sshll.u32 %s283_s3, 4  ;;  %s240_s29 = int_to_ptr.vmem [resolvable:$true] %s239_s29 }
   0x7   :  { %121 = vmatprep.mubr.f32.mxu0 %v280_v2  ;;  %v215_v26 = vunpack.c.0.s8 %v214_v24  ;;  %s258_s30 = scalar_lea.vmem %s240_s29, 32  ;;  %p263_p1 = scmp.lt.s32.totalorder %s240_s29, %s240_s29 }
   0x8   :  { %p259_p0 = scmp.ne.s32.totalorder %s240_s29, %s258_s30  ;;  %p264_p2 = scmp.lt.s32.totalorder %s258_s30, %s258_s30 }
   0x9   :  { %29 = vperm.xlu0 %256, %v25_v6   ;;  %v218_v33 = vsub.s32 %v215_v26, %v217_v27 }
   0xa   :  { %250 = vmatmul.mubr.msk.f32.gmra.mxu0 %vm39_vm1, %v23_v7  ;;  %p265_p3 = por %p264_p2, %p263_p1 }
   0xc   :  { %p266_p4 = pnand %p265_p3, %p259_p0 }
  0x80   :  { %v35_v8 = vpop.permute.xlu0 %34 }
  0x84   :  { %v30_v12 = vpop.permute.xlu0 %29 }
  0xc6   :  { %v117_v9 = vpop.f32.mrf.mxu0 }
  0xc7   :  { %v118_v17 = vadd.f32 %v117_v9, %v30_v12 }
  0xc8   :  { %v119_v10 = vpop.f32.mrf.mxu0 }
  0xc9   :  { %v120_v15 = vadd.f32 %v119_v10, %v30_v12  ;;  %v128_v21 = vmax.f32 %v118_v17, 0.0 }
  0xca   :  { %v123_v11 = vpop.f32.mrf.mxu0 }
  0xcb   :  { %v124_v13 = vadd.f32 %v123_v11, %v35_v8  ;;  %v129_v20 = vmax.f32 %v120_v15, 0.0 }
  0xcc   :  { %v125_v14 = vpop.f32.mrf.mxu0 }
  0xcd   :  { %v126_v16 = vadd.f32 %v125_v14, %v35_v8  ;;  %v130_v19 = vmax.f32 %v124_v13, 0.0 }
  0xcf   :  { %v131_v18 = vmax.f32 %v126_v16, 0.0 }
  0xd1   :  { %167 = vmatprep.subr.mxu1 %v131_v18 }
  0xd2   :  { %168 = vmatpush1.msra.mxu1 %v130_v19 }
  0xd3   :  { %169 = vmatprep.subr.mxu1 %v129_v20 }
  0xd4   :  { %170 = vmatpush1.msra.mxu1 %v128_v21 }
  0xd5   :  { %251 = vmatmul.mubr.msk.f32.vlgmr.msra.gmra.mxu1 %vm135_vm2, %v132_v22 }
 0x195   :  { %v205_v29 = vpop.f32.mrf.mxu1 }
 0x196   :  { %v206_v31 = vadd.f32 %v205_v29, %v134_v28 }
 0x197   :  { %v207_v30 = vpop.f32.mrf.mxu1 }
 0x198   :  { %v208_v32 = vadd.f32 %v207_v30, %v134_v28 }
 0x19a   :  { %v212_v34 = vcombine.low %v206_v31, %v208_v32 }
 0x19c   :  { %v219_v35 = vrot.slane %v212_v34, %v218_v33 }
 0x19e   :  { %v226_v36 = vrot.slane %v219_v35, %v218_v33 }
 0x1a0   :  { %232 = vst.msk [vmem:[#allocation3] sm:$0x3] %vm230_vm3, %v226_v36 }
 0x1a1   :  { %269 = shalt.err (!%p266_p4)
}
 0x1a2   :  { %242 = dma.vmem_to_hbm [thread:$0]  %s240_s29, 32, %s343_s5, [#allocation4]  }
 0x1a3   :  { %278 = dma.done.wait [#allocation4], 32  }
 0x1a4   :  { %279 = vsyncadd [#allocation4], 4294967264 }
 0x1a5   :  { %246 = vsyncpa [#allocation4], 1 }

</bundles_post_ra>
